<compile_context>
chip_gen: v7x
topology: tpu7x:2x2x1
jax: 0.10.0
libtpu: 0.0.40
codegen_flags: <defaults>
</compile_context>

<pallas_src>
import functools

import jax
import jax.numpy as jnp
import numpy as np
from jax.experimental import pallas as pl
from jax.experimental.pallas import tpu as pltpu


def _round_up(x: int, m: int) -> int:
    return (x + m - 1) // m * m


_MAX_UNROLL_LAYERS = 4


def _highway_kernel(x_ref, w_ref, b_ref, out_ref, *,
                    num_layers, dp, activation, mxu_dtype):
    # x_ref:   (TB, Dp)       io dtype (f32 or bf16)
    # w_ref:   (L, Dp, 2*Dp)  fused [W_nl^T | W_g^T]   (bf16 or f32)
    # b_ref:   (L, 1, 2*Dp)   fused [b_nl | b_g]       (f32)
    # out_ref: (TB, Dp)       io dtype
    cur = x_ref[...].astype(jnp.float32)

    def layer(l, cur):
        # One fused MXU matmul per layer; columns [:dp] -> nonlinear, [dp:] -> gate.
        proj = jnp.dot(cur.astype(mxu_dtype), w_ref[l],
                       preferred_element_type=jnp.float32) + b_ref[l]
        nonlin = activation(proj[:, :dp])
        gate = jax.nn.sigmoid(proj[:, dp:])
        # y = g*x + (1-g)*f  ==  f + g*(x - f)   (saves one f32 VPU multiply)
        return nonlin + gate * (cur - nonlin)

    if num_layers <= _MAX_UNROLL_LAYERS:
        for l in range(num_layers):
            cur = layer(l, cur)
    else:
        cur = jax.lax.fori_loop(0, num_layers, layer, cur)

    out_ref[...] = cur.astype(out_ref.dtype)


def prepare_highway_params(layer_weights, layer_biases, *, use_bf16=True):
    """One-time weight prep (hoisted off the per-call path).

    Each torch Linear weight (2D, D) is split into nonlinear / gate halves,
    transposed for `x @ W^T`, zero-padded to lane-aligned Dp, and concatenated
    along the output dim into a single (Dp, 2*Dp) RHS per layer.  Padded rows /
    columns are zero, so padded lanes never contaminate real lanes.
    """
    assert len(layer_weights) == len(layer_biases) >= 1
    L = len(layer_weights)
    D = int(jnp.asarray(layer_weights[0]).shape[1])
    Dp = max(_round_up(D, 128), 128)

    w_list, b_list = [], []
    for W, b in zip(layer_weights, layer_biases):
        W = jnp.asarray(W, jnp.float32)          # (2D, D)
        b = jnp.asarray(b, jnp.float32)          # (2D,)
        w_nl_t = jnp.pad(W[:D, :].T, ((0, Dp - D), (0, Dp - D)))
        w_g_t = jnp.pad(W[D:2 * D, :].T, ((0, Dp - D), (0, Dp - D)))
        w_list.append(jnp.concatenate([w_nl_t, w_g_t], axis=1))          # (Dp, 2Dp)
        b_list.append(jnp.concatenate([jnp.pad(b[:D], (0, Dp - D)),
                                       jnp.pad(b[D:2 * D], (0, Dp - D))]))

    w_dtype = jnp.bfloat16 if use_bf16 else jnp.float32
    w_fused = jnp.stack(w_list).astype(w_dtype)                          # (L, Dp, 2Dp)
    b_fused = jnp.stack(b_list).reshape(L, 1, 2 * Dp).astype(jnp.float32)
    return {"w": w_fused, "b": b_fused, "input_dim": D, "padded_dim": Dp}


def highway_apply(params, inputs, activation=None, *, max_batch_tile=512):
    """Apply the Highway stack.  IO dtype follows `inputs` (f32 or bf16)."""
    if activation is None:
        activation = lambda v: jnp.maximum(v, 0.0)           # F.relu

    w, b = params["w"], params["b"]
    D, Dp = params["input_dim"], params["padded_dim"]
    L = int(w.shape[0])

    x = jnp.asarray(inputs)
    assert x.ndim == 2 and x.shape[1] == D
    B = int(x.shape[0])

    io_dtype = jnp.bfloat16 if x.dtype == jnp.bfloat16 else jnp.float32
    x = x.astype(io_dtype)
    if Dp != D:
        # Rare path (D % 128 != 0): pad feature dim; zero weight rows/cols keep it inert.
        x = jnp.pad(x, ((0, 0), (0, Dp - D)))

    TB = min(_round_up(B, 8), _round_up(max_batch_tile, 8))
    grid = (pl.cdiv(B, TB),)

    io_bytes = 2 if io_dtype == jnp.bfloat16 else 4
    w_bytes = int(w.size) * int(w.dtype.itemsize)
    b_bytes = L * 8 * 2 * Dp * 4                              # sublane-padded bias

    kernel = functools.partial(
        _highway_kernel, num_layers=L, dp=Dp,
        activation=activation, mxu_dtype=w.dtype)

    def _run(single_buffer_weights):
        resident_kw = ({"pipeline_mode": pl.Buffered(1)}
                       if single_buffer_weights else {})
        n_wbuf = 1 if single_buffer_weights else 2
        vmem_needed = (n_wbuf * (w_bytes + b_bytes)
                       + 2 * 2 * TB * Dp * io_bytes           # x/out double buffers
                       + 8 * TB * Dp * 4                      # f32 temporaries
                       + (8 << 20))                           # slack
        vmem_limit = int(min(max(vmem_needed, 32 << 20), 64 << 20))
        return pl.pallas_call(
            kernel,
            out_shape=jax.ShapeDtypeStruct((B, Dp), io_dtype),
            grid_spec=pltpu.PrefetchScalarGridSpec(
                num_scalar_prefetch=0,
                grid=grid,
                in_specs=[
                    pl.BlockSpec((TB, Dp), lambda i: (i, 0)),                 # x tile
                    pl.BlockSpec((L, Dp, 2 * Dp), lambda i: (0, 0, 0),        # fused W^T
                                 **resident_kw),
                    pl.BlockSpec((L, 1, 2 * Dp), lambda i: (0, 0, 0),         # fused bias
                                 **resident_kw),
                ],
                out_specs=pl.BlockSpec((TB, Dp), lambda i: (i, 0)),
            ),
            compiler_params=pltpu.CompilerParams(
                dimension_semantics=("parallel",),
                vmem_limit_bytes=vmem_limit,
            ),
        )(x, w, b)

    try:
        out = _run(True)
    except Exception:
        # pl.Buffered(1) unsupported on this jax/libtpu -> default double buffering.
        out = _run(False)

    return out if Dp == D else out[:, :D]


def _reference_numpy(x, weights, biases):
    """Pure-numpy Highway forward matching the torch module semantics."""
    def sig(v):
        return 1.0 / (1.0 + np.exp(-v))

    cur = np.asarray(x, np.float32)
    D = cur.shape[1]
    for W, b in zip(weights, biases):
        W = np.asarray(W, np.float32)
        b = np.asarray(b, np.float32)
        proj = cur @ W.T + b
        nonlin = np.maximum(proj[:, :D], 0.0)
        gate = sig(proj[:, D:2 * D])
        cur = gate * cur + (1.0 - gate) * nonlin
    return cur


if __name__ == "__main__":
    # Small shapes consistent with the module's (batch, input_dim) forward.
    input_dim = 128           # lane-aligned -> no feature padding path
    num_layers = 2
    batch = 13                # not a tile multiple -> exercises the partial block

    key = jax.random.PRNGKey(0)
    keys = jax.random.split(key, 2 * num_layers + 1)

    layer_weights, layer_biases = [], []
    for l in range(num_layers):
        W = 0.1 * jax.random.normal(keys[2 * l], (2 * input_dim, input_dim),
                                    jnp.float32)
        b_nl = 0.1 * jax.random.normal(keys[2 * l + 1], (input_dim,), jnp.float32)
        b_gate = jnp.ones((input_dim,), jnp.float32)   # torch init: gate bias = 1
        layer_weights.append(W)
        layer_biases.append(jnp.concatenate([b_nl, b_gate]))

    x = jax.random.normal(keys[-1], (batch, input_dim), jnp.float32)

    ref = _reference_numpy(np.asarray(x),
                           [np.asarray(w) for w in layer_weights],
                           [np.asarray(b) for b in layer_biases])

    # Exact path: f32 weights, f32 IO.
    params_f32 = prepare_highway_params(layer_weights, layer_biases, use_bf16=False)
    out_f32 = jax.block_until_ready(highway_apply(params_f32, x))
    np.testing.assert_allclose(np.asarray(out_f32), ref, atol=1e-5, rtol=1e-5)

    # Fast path: bf16 weights on the MXU, f32 accumulation / gate math, f32 IO.
    params_bf16 = prepare_highway_params(layer_weights, layer_biases, use_bf16=True)
    out_fast = jax.block_until_ready(highway_apply(params_bf16, x))
    np.testing.assert_allclose(np.asarray(out_fast), ref, atol=5e-2, rtol=5e-2)

    # bf16 IO path: caller passes bf16 activations, kernel IO is bf16 (halved HBM traffic).
    out_bf16 = jax.block_until_ready(
        highway_apply(params_bf16, x.astype(jnp.bfloat16)))
    np.testing.assert_allclose(np.asarray(jnp.asarray(out_bf16, jnp.float32)), ref,
                               atol=5e-2, rtol=5e-2)

    assert out_f32.shape == (batch, input_dim)
    print("KERNEL_OK")
</pallas_src>

<mosaic_0001>
module attributes {stable_mosaic.version = 11 : i64} {
  func.func @_highway_kernel(%arg0: i32, %arg1: memref<16x128xf32, #tpu.memory_space<vmem>>, %arg2: memref<2x128x256xf32, #tpu.memory_space<vmem>>, %arg3: memref<2x1x256xf32, #tpu.memory_space<vmem>>, %arg4: memref<16x128xf32, #tpu.memory_space<vmem>>) attributes {dimension_semantics = [#tpu.dimension_semantics<parallel>], iteration_bounds = array<i64: 1>, scalar_prefetch = 0 : i64, scratch_operands = 0 : i64, tpu.core_type = #tpu.core_type<tc>, window_params = [{transform_indices = @transform_0, window_bounds = array<i64: 16, 128>}, {pipeline_mode = #tpu.pipeline_mode<synchronous>, transform_indices = @transform_1, window_bounds = array<i64: 2, 128, 256>}, {pipeline_mode = #tpu.pipeline_mode<synchronous>, transform_indices = @transform_2, window_bounds = array<i64: 2, 1, 256>}, {transform_indices = @transform_3, window_bounds = array<i64: 16, 128>}]} {
    %c0 = arith.constant 0 : index
    %c0_0 = arith.constant 0 : index
    %0 = vector.load %arg1[%c0, %c0_0] : memref<16x128xf32, #tpu.memory_space<vmem>>, vector<16x128xf32>
    %c0_1 = arith.constant 0 : index
    %c0_2 = arith.constant 0 : index
    %c0_3 = arith.constant 0 : index
    %1 = vector.load %arg2[%c0_1, %c0_2, %c0_3] : memref<2x128x256xf32, #tpu.memory_space<vmem>>, vector<1x128x256xf32>
    %2 = vector.shape_cast %1 : vector<1x128x256xf32> to vector<128x256xf32>
    %cst = arith.constant dense<0.000000e+00> : vector<16x256xf32>
    %3 = tpu.matmul %0, %2, %cst {dimension_numbers = #tpu.dot_dimension_numbers<[1], [0], [0], [1], [0, 0, 1, 1], [], []>} : vector<16x128xf32>, vector<128x256xf32>, vector<16x256xf32> -> vector<16x256xf32>
    %c0_4 = arith.constant 0 : index
    %c0_5 = arith.constant 0 : index
    %c0_6 = arith.constant 0 : index
    %4 = vector.load %arg3[%c0_4, %c0_5, %c0_6] : memref<2x1x256xf32, #tpu.memory_space<vmem>>, vector<1x1x256xf32>
    %5 = vector.shape_cast %4 : vector<1x1x256xf32> to vector<1x256xf32>
    %6 = vector.broadcast %5 : vector<1x256xf32> to vector<16x256xf32>
    %7 = arith.addf %3, %6 : vector<16x256xf32>
    %8 = vector.extract_strided_slice %7 {offsets = [0, 0], sizes = [16, 128], strides = [1, 1]} : vector<16x256xf32> to vector<16x128xf32>
    %cst_7 = arith.constant 0.000000e+00 : f32
    %9 = vector.broadcast %cst_7 : f32 to vector<16x128xf32>
    %10 = arith.maximumf %8, %9 : vector<16x128xf32>
    %11 = vector.extract_strided_slice %7 {offsets = [0, 128], sizes = [16, 128], strides = [1, 1]} : vector<16x256xf32> to vector<16x128xf32>
    %12 = arith.negf %11 : vector<16x128xf32>
    %13 = math.exp %12 : vector<16x128xf32>
    %cst_8 = arith.constant 1.000000e+00 : f32
    %14 = vector.broadcast %cst_8 : f32 to vector<16x128xf32>
    %15 = arith.addf %14, %13 : vector<16x128xf32>
    %16 = arith.divf %14, %15 : vector<16x128xf32>
    %17 = arith.subf %0, %10 : vector<16x128xf32>
    %18 = arith.mulf %16, %17 : vector<16x128xf32>
    %19 = arith.addf %10, %18 : vector<16x128xf32>
    %c1 = arith.constant 1 : index
    %c0_9 = arith.constant 0 : index
    %c0_10 = arith.constant 0 : index
    %20 = vector.load %arg2[%c1, %c0_9, %c0_10] : memref<2x128x256xf32, #tpu.memory_space<vmem>>, vector<1x128x256xf32>
    %21 = vector.shape_cast %20 : vector<1x128x256xf32> to vector<128x256xf32>
    %cst_11 = arith.constant dense<0.000000e+00> : vector<16x256xf32>
    %22 = tpu.matmul %19, %21, %cst_11 {dimension_numbers = #tpu.dot_dimension_numbers<[1], [0], [0], [1], [0, 0, 1, 1], [], []>} : vector<16x128xf32>, vector<128x256xf32>, vector<16x256xf32> -> vector<16x256xf32>
    %c1_12 = arith.constant 1 : index
    %c0_13 = arith.constant 0 : index
    %c0_14 = arith.constant 0 : index
    %23 = vector.load %arg3[%c1_12, %c0_13, %c0_14] : memref<2x1x256xf32, #tpu.memory_space<vmem>>, vector<1x1x256xf32>
    %24 = vector.shape_cast %23 : vector<1x1x256xf32> to vector<1x256xf32>
    %25 = vector.broadcast %24 : vector<1x256xf32> to vector<16x256xf32>
    %26 = arith.addf %22, %25 : vector<16x256xf32>
    %27 = vector.extract_strided_slice %26 {offsets = [0, 0], sizes = [16, 128], strides = [1, 1]} : vector<16x256xf32> to vector<16x128xf32>
    %cst_15 = arith.constant 0.000000e+00 : f32
    %28 = vector.broadcast %cst_15 : f32 to vector<16x128xf32>
    %29 = arith.maximumf %27, %28 : vector<16x128xf32>
    %30 = vector.extract_strided_slice %26 {offsets = [0, 128], sizes = [16, 128], strides = [1, 1]} : vector<16x256xf32> to vector<16x128xf32>
    %31 = arith.negf %30 : vector<16x128xf32>
    %32 = math.exp %31 : vector<16x128xf32>
    %cst_16 = arith.constant 1.000000e+00 : f32
    %33 = vector.broadcast %cst_16 : f32 to vector<16x128xf32>
    %34 = arith.addf %33, %32 : vector<16x128xf32>
    %35 = arith.divf %33, %34 : vector<16x128xf32>
    %36 = arith.subf %19, %29 : vector<16x128xf32>
    %37 = arith.mulf %35, %36 : vector<16x128xf32>
    %38 = arith.addf %29, %37 : vector<16x128xf32>
    %c0_17 = arith.constant 0 : index
    %c0_18 = arith.constant 0 : index
    %39 = vector.load %arg4[%c0_17, %c0_18] : memref<16x128xf32, #tpu.memory_space<vmem>>, vector<16x128xf32>
    tpu.vector_store %arg4[%c0_17, %c0_18], %38 {strides = array<i32>} : memref<16x128xf32, #tpu.memory_space<vmem>>, vector<16x128xf32>,
    return
  }
  func.func @transform_0(%arg0: i32) -> (i32, i32) {
    %c0_i32 = arith.constant 0 : i32
    %c0_i32_0 = arith.constant 0 : i32
    return %arg0, %c0_i32 : i32, i32
  }
  func.func @transform_1(%arg0: i32) -> (i32, i32, i32) {
    %c0_i32 = arith.constant 0 : i32
    %c0_i32_0 = arith.constant 0 : i32
    %c0_i32_1 = arith.constant 0 : i32
    %c0_i32_2 = arith.constant 0 : i32
    return %c0_i32, %c0_i32_0, %c0_i32_1 : i32, i32, i32
  }
  func.func @transform_2(%arg0: i32) -> (i32, i32, i32) {
    %c0_i32 = arith.constant 0 : i32
    %c0_i32_0 = arith.constant 0 : i32
    %c0_i32_1 = arith.constant 0 : i32
    %c0_i32_2 = arith.constant 0 : i32
    return %c0_i32, %c0_i32_0, %c0_i32_1 : i32, i32, i32
  }
  func.func @transform_3(%arg0: i32) -> (i32, i32) {
    %c0_i32 = arith.constant 0 : i32
    %c0_i32_0 = arith.constant 0 : i32
    return %arg0, %c0_i32 : i32, i32
  }
}

module attributes {stable_mosaic.version = 11 : i64} {
  func.func @_highway_kernel(%arg0: i32, %arg1: memref<16x128xf32, #tpu.memory_space<vmem>>, %arg2: memref<2x128x256xf32, #tpu.memory_space<vmem>>, %arg3: memref<2x1x256xf32, #tpu.memory_space<vmem>>, %arg4: memref<16x128xf32, #tpu.memory_space<vmem>>) attributes {dimension_semantics = [#tpu.dimension_semantics<parallel>], iteration_bounds = array<i64: 1>, scalar_prefetch = 0 : i64, scratch_operands = 0 : i64, tpu.core_type = #tpu.core_type<tc>, window_params = [{transform_indices = @transform_0, window_bounds = array<i64: 16, 128>}, {pipeline_mode = #tpu.pipeline_mode<synchronous>, transform_indices = @transform_1, window_bounds = array<i64: 2, 128, 256>}, {pipeline_mode = #tpu.pipeline_mode<synchronous>, transform_indices = @transform_2, window_bounds = array<i64: 2, 1, 256>}, {transform_indices = @transform_3, window_bounds = array<i64: 16, 128>}]} {
    %c0 = arith.constant 0 : index
    %c0_0 = arith.constant 0 : index
    %0 = vector.load %arg1[%c0, %c0_0] : memref<16x128xf32, #tpu.memory_space<vmem>>, vector<16x128xf32>
    %c0_1 = arith.constant 0 : index
    %c0_2 = arith.constant 0 : index
    %c0_3 = arith.constant 0 : index
    %1 = vector.load %arg2[%c0_1, %c0_2, %c0_3] : memref<2x128x256xf32, #tpu.memory_space<vmem>>, vector<1x128x256xf32>
    %2 = vector.shape_cast %1 : vector<1x128x256xf32> to vector<128x256xf32>
    %cst = arith.constant dense<0.000000e+00> : vector<16x256xf32>
    %3 = tpu.matmul %0, %2, %cst {dimension_numbers = #tpu.dot_dimension_numbers<[1], [0], [0], [1], [0, 0, 1, 1], [], []>} : vector<16x128xf32>, vector<128x256xf32>, vector<16x256xf32> -> vector<16x256xf32>
    %c0_4 = arith.constant 0 : index
    %c0_5 = arith.constant 0 : index
    %c0_6 = arith.constant 0 : index
    %4 = vector.load %arg3[%c0_4, %c0_5, %c0_6] : memref<2x1x256xf32, #tpu.memory_space<vmem>>, vector<1x1x256xf32>
    %5 = vector.shape_cast %4 : vector<1x1x256xf32> to vector<1x256xf32>
    %6 = vector.broadcast %5 : vector<1x256xf32> to vector<16x256xf32>
    %7 = arith.addf %3, %6 : vector<16x256xf32>
    %8 = vector.extract_strided_slice %7 {offsets = [0, 0], sizes = [16, 128], strides = [1, 1]} : vector<16x256xf32> to vector<16x128xf32>
    %cst_7 = arith.constant 0.000000e+00 : f32
    %9 = vector.broadcast %cst_7 : f32 to vector<16x128xf32>
    %10 = arith.maximumf %8, %9 : vector<16x128xf32>
    %11 = vector.extract_strided_slice %7 {offsets = [0, 128], sizes = [16, 128], strides = [1, 1]} : vector<16x256xf32> to vector<16x128xf32>
    %12 = arith.negf %11 : vector<16x128xf32>
    %13 = math.exp %12 : vector<16x128xf32>
    %cst_8 = arith.constant 1.000000e+00 : f32
    %14 = vector.broadcast %cst_8 : f32 to vector<16x128xf32>
    %15 = arith.addf %14, %13 : vector<16x128xf32>
    %16 = arith.divf %14, %15 : vector<16x128xf32>
    %17 = arith.subf %0, %10 : vector<16x128xf32>
    %18 = arith.mulf %16, %17 : vector<16x128xf32>
    %19 = arith.addf %10, %18 : vector<16x128xf32>
    %c1 = arith.constant 1 : index
    %c0_9 = arith.constant 0 : index
    %c0_10 = arith.constant 0 : index
    %20 = vector.load %arg2[%c1, %c0_9, %c0_10] : memref<2x128x256xf32, #tpu.memory_space<vmem>>, vector<1x128x256xf32>
    %21 = vector.shape_cast %20 : vector<1x128x256xf32> to vector<128x256xf32>
    %cst_11 = arith.constant dense<0.000000e+00> : vector<16x256xf32>
    %22 = tpu.matmul %19, %21, %cst_11 {dimension_numbers = #tpu.dot_dimension_numbers<[1], [0], [0], [1], [0, 0, 1, 1], [], []>} : vector<16x128xf32>, vector<128x256xf32>, vector<16x256xf32> -> vector<16x256xf32>
    %c1_12 = arith.constant 1 : index
    %c0_13 = arith.constant 0 : index
    %c0_14 = arith.constant 0 : index
    %23 = vector.load %arg3[%c1_12, %c0_13, %c0_14] : memref<2x1x256xf32, #tpu.memory_space<vmem>>, vector<1x1x256xf32>
    %24 = vector.shape_cast %23 : vector<1x1x256xf32> to vector<1x256xf32>
    %25 = vector.broadcast %24 : vector<1x256xf32> to vector<16x256xf32>
    %26 = arith.addf %22, %25 : vector<16x256xf32>
    %27 = vector.extract_strided_slice %26 {offsets = [0, 0], sizes = [16, 128], strides = [1, 1]} : vector<16x256xf32> to vector<16x128xf32>
    %cst_15 = arith.constant 0.000000e+00 : f32
    %28 = vector.broadcast %cst_15 : f32 to vector<16x128xf32>
    %29 = arith.maximumf %27, %28 : vector<16x128xf32>
    %30 = vector.extract_strided_slice %26 {offsets = [0, 128], sizes = [16, 128], strides = [1, 1]} : vector<16x256xf32> to vector<16x128xf32>
    %31 = arith.negf %30 : vector<16x128xf32>
    %32 = math.exp %31 : vector<16x128xf32>
    %cst_16 = arith.constant 1.000000e+00 : f32
    %33 = vector.broadcast %cst_16 : f32 to vector<16x128xf32>
    %34 = arith.addf %33, %32 : vector<16x128xf32>
    %35 = arith.divf %33, %34 : vector<16x128xf32>
    %36 = arith.subf %19, %29 : vector<16x128xf32>
    %37 = arith.mulf %35, %36 : vector<16x128xf32>
    %38 = arith.addf %29, %37 : vector<16x128xf32>
    %c0_17 = arith.constant 0 : index
    %c0_18 = arith.constant 0 : index
    %39 = vector.load %arg4[%c0_17, %c0_18] : memref<16x128xf32, #tpu.memory_space<vmem>>, vector<16x128xf32>
    tpu.vector_store %arg4[%c0_17, %c0_18], %38 {strides = array<i32>} : memref<16x128xf32, #tpu.memory_space<vmem>>, vector<16x128xf32>,
    return
  }
  func.func @transform_0(%arg0: i32) -> (i32, i32) {
    %c0_i32 = arith.constant 0 : i32
    %c0_i32_0 = arith.constant 0 : i32
    return %arg0, %c0_i32 : i32, i32
  }
  func.func @transform_1(%arg0: i32) -> (i32, i32, i32) {
    %c0_i32 = arith.constant 0 : i32
    %c0_i32_0 = arith.constant 0 : i32
    %c0_i32_1 = arith.constant 0 : i32
    %c0_i32_2 = arith.constant 0 : i32
    return %c0_i32, %c0_i32_0, %c0_i32_1 : i32, i32, i32
  }
  func.func @transform_2(%arg0: i32) -> (i32, i32, i32) {
    %c0_i32 = arith.constant 0 : i32
    %c0_i32_0 = arith.constant 0 : i32
    %c0_i32_1 = arith.constant 0 : i32
    %c0_i32_2 = arith.constant 0 : i32
    return %c0_i32, %c0_i32_0, %c0_i32_1 : i32, i32, i32
  }
  func.func @transform_3(%arg0: i32) -> (i32, i32) {
    %c0_i32 = arith.constant 0 : i32
    %c0_i32_0 = arith.constant 0 : i32
    return %arg0, %c0_i32 : i32, i32
  }
}

</mosaic_0001>

<bundles_post_ra>
// kernel: tpu_custom_call.1
= control target key start
LH: loop header
LB: loop body
LE: loop exit
PB: predicated region body
PF: predicated region fallthrough
CT: control target
= control target key end

     0   :  { %8 = vsyncpa [#allocation3], 0  ;;  %s602_s0 = inlined_call_operand.hbm [shape: f32[13,128], index: 0, kind: input, shape index: {}]   ;;  %s603_s1 = inlined_call_operand.hbm [shape: f32[2,128,256], index: 1, kind: input, shape index: {}]   ;;  %s604_s2 = inlined_call_operand.vmem [shape: f32[2,1,256], index: 2, kind: input, shape index: {}]   ;;  %s605_s3 = inlined_call_operand.hbm [shape: f32[13,128], index: 3, kind: output, shape index: {}]  }
   0x1   :  { %9 = vsyncpa [#allocation6], 0 }
   0x2   :  { %10 = vsyncpa [#allocation4], 0  ;;  %s514_s12 = smov [#allocation2]   ;;  %s442_s16 = scalar_lea.hbm %s602_s0, 256 }
   0x3   :  { %s16_s13 = sshll.u32 %s514_s12, 4  ;;  %p443_p0 = scmp.ne.s32.totalorder %s602_s0, %s442_s16  ;;  %s17_s13 = int_to_ptr.vmem [resolvable:$true] %s16_s13 }
   0x4   :  { %p446_p1 = scmp.lt.u32.totalorder %s442_s16, %s602_s0 }
   0x6   :  { %p448_p2 = pnand %p446_p1, %p443_p0 }
   0x8   :  { %451 = shalt.err (!%p448_p2)
}
   0x9   :  { %s452_s21 = scalar_lea.vmem %s17_s13, 256  ;;  %p457_p4 = scmp.lt.s32.totalorder %s17_s13, %s17_s13 }
   0xa   :  { %p453_p3 = scmp.ne.s32.totalorder %s17_s13, %s452_s21  ;;  %p458_p5 = scmp.lt.s32.totalorder %s452_s21, %s452_s21 }
   0xc   :  { %p459_p6 = por %p458_p5, %p457_p4 }
   0xe   :  { %p460_p7 = pnand %p459_p6, %p453_p3 }
  0x10   :  { %463 = shalt.err (!%p460_p7)
}
  0x11   :  { %s515_s22 = smov 128   ;;  %s516_s23 = smov 8  }
  0x12   :  { %22 = dma.hbm_to_vmem [thread:$0]  %s602_s0, 256, %s17_s13, [#allocation3], %s515_s22, %s515_s22, %s516_s23  }
  0x13   :  { %s517_s26 = smov [#allocation5]   ;;  %s464_s30 = scalar_lea.hbm %s603_s1, 8192 }
  0x14   :  { %s28_s27 = sshll.u32 %s517_s26, 4  ;;  %p465_p8 = scmp.ne.s32.totalorder %s603_s1, %s464_s30  ;;  %s29_s27 = int_to_ptr.vmem [resolvable:$true] %s28_s27 }
  0x15   :  { %p468_p9 = scmp.lt.u32.totalorder %s464_s30, %s603_s1 }
  0x17   :  { %p470_p10 = pnand %p468_p9, %p465_p8 }
  0x19   :  { %473 = shalt.err (!%p470_p10)
}
  0x1a   :  { %s474_s8 = scalar_lea.vmem %s29_s27, 8192  ;;  %p479_p12 = scmp.lt.s32.totalorder %s29_s27, %s29_s27 }
  0x1b   :  { %p475_p11 = scmp.ne.s32.totalorder %s29_s27, %s474_s8  ;;  %p480_p13 = scmp.lt.s32.totalorder %s474_s8, %s474_s8 }
  0x1d   :  { %p481_p0 = por %p480_p13, %p479_p12 }
  0x1f   :  { %p482_p1 = pnand %p481_p0, %p475_p11 }
  0x21   :  { %485 = shalt.err (!%p482_p1)
}
  0x22   :  { %s518_s0 = smov 256   ;;  %s519_s9 = smov 16  }
  0x23   :  { %34 = dma.hbm_to_vmem [thread:$0]  %s603_s1, 8192, %s29_s27, [#allocation6], %s518_s0, %s518_s0, %s519_s9  }
  0x24   :  { %508 = dma.done.wait [#allocation3], 256  }
  0x25   :  { %509 = vsyncadd [#allocation3], 4294967040 }
  0x26   :  { %510 = dma.done.wait [#allocation6], 8192  }
  0x27   :  { %511 = vsyncadd [#allocation6], 4294959104  ;;  %v520_v0 = vmov 0.0   ;;  %v46_v1 = vld [vmem:[#allocation5 + $0x8] sm:$0xff]  ;;  %v48_v2 = vld [vmem:[#allocation5 + $0x18] sm:$0xff] }
  0x28   :  { %153 = vmatprep.mubr.f32.mxu0 %v520_v0  ;;  %296 = vmatprep.mubr.f32.mxu1 %v520_v0  ;;  %v45_v3 = vld [vmem:[#allocation5] sm:$0xff]  ;;  %v354_v4 = vpack.c.bf16 %v48_v2, %v46_v1  ;;  %v47_v5 = vld [vmem:[#allocation5 + $0x10] sm:$0xff]  ;;  %v50_v6 = vld [vmem:[#allocation5 + $0x28] sm:$0xff] }
  0x29   :  { %v52_v7 = vld [vmem:[#allocation5 + $0x38] sm:$0xff]  ;;  %v356_v8 = vpack.c.bf16 %v47_v5, %v45_v3  ;;  %v49_v10 = vld [vmem:[#allocation5 + $0x20] sm:$0xff]  ;;  %v51_v11 = vld [vmem:[#allocation5 + $0x30] sm:$0xff] }
  0x2a   :  { %v358_v9 = vpack.c.bf16 %v52_v7, %v50_v6  ;;  %v54_v12 = vld [vmem:[#allocation5 + $0x48] sm:$0xff]  ;;  %355 = vmatprep.subr.bf16.mxu0 %v354_v4  ;;  %v56_v13 = vld [vmem:[#allocation5 + $0x58] sm:$0xff]  ;;  %v360_v14 = vpack.c.bf16 %v51_v11, %v49_v10  ;;  %v53_v16 = vld [vmem:[#allocation5 + $0x40] sm:$0xff] }
  0x2b   :  { %357 = vmatpush1.bf16.msra.mxu0 %v356_v8  ;;  %v362_v15 = vpack.c.bf16 %v56_v13, %v54_v12  ;;  %v55_v17 = vld [vmem:[#allocation5 + $0x50] sm:$0xff]  ;;  %v58_v18 = vld [vmem:[#allocation5 + $0x68] sm:$0xff]  ;;  %v60_v19 = vld [vmem:[#allocation5 + $0x78] sm:$0xff] }
  0x2c   :  { %359 = vmatprep.subr.bf16.mxu0 %v358_v9  ;;  %v364_v20 = vpack.c.bf16 %v55_v17, %v53_v16  ;;  %v366_v21 = vpack.c.bf16 %v60_v19, %v58_v18  ;;  %v57_v22 = vld [vmem:[#allocation5 + $0x60] sm:$0xff]  ;;  %v59_v23 = vld [vmem:[#allocation5 + $0x70] sm:$0xff]  ;;  %v62_v24 = vld [vmem:[#allocation5 + $0x88] sm:$0xff] }
  0x2d   :  { %v64_v25 = vld [vmem:[#allocation5 + $0x98] sm:$0xff]  ;;  %v368_v26 = vpack.c.bf16 %v59_v23, %v57_v22  ;;  %v61_v28 = vld [vmem:[#allocation5 + $0x80] sm:$0xff]  ;;  %v63_v29 = vld [vmem:[#allocation5 + $0x90] sm:$0xff] }
  0x2e   :  { %v370_v27 = vpack.c.bf16 %v64_v25, %v62_v24  ;;  %v66_v30 = vld [vmem:[#allocation5 + $0xa8] sm:$0xff]  ;;  %v68_v31 = vld [vmem:[#allocation5 + $0xb8] sm:$0xff]  ;;  %v372_v32 = vpack.c.bf16 %v63_v29, %v61_v28  ;;  %v65_v34 = vld [vmem:[#allocation5 + $0xa0] sm:$0xff] }
  0x2f   :  { %361 = vmatpush1.bf16.msra.mxu0 %v360_v14  ;;  %v374_v33 = vpack.c.bf16 %v68_v31, %v66_v30  ;;  %v67_v35 = vld [vmem:[#allocation5 + $0xb0] sm:$0xff]  ;;  %v70_v36 = vld [vmem:[#allocation5 + $0xc8] sm:$0xff]  ;;  %v72_v37 = vld [vmem:[#allocation5 + $0xd8] sm:$0xff] }
  0x30   :  { %363 = vmatprep.subr.bf16.mxu0 %v362_v15  ;;  %v376_v38 = vpack.c.bf16 %v67_v35, %v65_v34  ;;  %v378_v39 = vpack.c.bf16 %v72_v37, %v70_v36  ;;  %v69_v40 = vld [vmem:[#allocation5 + $0xc0] sm:$0xff]  ;;  %v71_v41 = vld [vmem:[#allocation5 + $0xd0] sm:$0xff]  ;;  %v74_v42 = vld [vmem:[#allocation5 + $0xe8] sm:$0xff]  ;;  %v79_v36 = vlaneseq }
  0x31   :  { %v76_v43 = vld [vmem:[#allocation5 + $0xf8] sm:$0xff]  ;;  %v380_v44 = vpack.c.bf16 %v71_v41, %v69_v40  ;;  %v73_v46 = vld [vmem:[#allocation5 + $0xe0] sm:$0xff]  ;;  %v75_v47 = vld [vmem:[#allocation5 + $0xf0] sm:$0xff] }
  0x32   :  { %v382_v45 = vpack.c.bf16 %v76_v43, %v74_v42  ;;  %v384_v48 = vpack.c.bf16 %v75_v47, %v73_v46  ;;  %v571_v49 = vld [vmem:[#allocation2] sm:$0xff]  ;;  %v575_v50 = vld [vmem:[#allocation2 + $0x8] sm:$0xff]  ;;  %v188_v51 = vld [vmem:[#allocation5 + $0x108] sm:$0xff]  ;;  %v80_v37 = vshrl.u32 %v79_v36, 7 }
  0x33   :  { %365 = vmatpush1.bf16.msra.mxu0 %v364_v20  ;;  %v190_v52 = vld [vmem:[#allocation5 + $0x118] sm:$0xff]  ;;  %v187_v54 = vld [vmem:[#allocation5 + $0x100] sm:$0xff]  ;;  %v189_v55 = vld [vmem:[#allocation5 + $0x110] sm:$0xff] }
  0x34   :  { %367 = vmatprep.subr.bf16.mxu0 %v366_v21  ;;  %v386_v53 = vpack.c.bf16 %v190_v52, %v188_v51  ;;  %v388_v56 = vpack.c.bf16 %v189_v55, %v187_v54  ;;  %v192_v57 = vld [vmem:[#allocation5 + $0x128] sm:$0xff]  ;;  %v194_v58 = vld [vmem:[#allocation5 + $0x138] sm:$0xff]  ;;  %v191_v60 = vld [vmem:[#allocation5 + $0x120] sm:$0xff]  ;;  %v81_v51 = vsub.s32 0, %v80_v37 }
  0x35   :  { %v390_v59 = vpack.c.bf16 %v194_v58, %v192_v57  ;;  %v193_v61 = vld [vmem:[#allocation5 + $0x130] sm:$0xff]  ;;  %v196_v63 = vld [vmem:[#allocation5 + $0x148] sm:$0xff]  ;;  %v198_v1 = vld [vmem:[#allocation5 + $0x158] sm:$0xff] }
  0x36   :  { %387 = vmatprep.subr.bf16.mxu1 %v386_v53  ;;  %v392_v62 = vpack.c.bf16 %v193_v61, %v191_v60  ;;  %v394_v2 = vpack.c.bf16 %v198_v1, %v196_v63  ;;  %v195_v3 = vld [vmem:[#allocation5 + $0x140] sm:$0xff]  ;;  %v197_v4 = vld [vmem:[#allocation5 + $0x150] sm:$0xff]  ;;  %v200_v6 = vld [vmem:[#allocation5 + $0x168] sm:$0xff] }
  0x37   :  { %369 = vmatpush1.bf16.msra.mxu0 %v368_v26  ;;  %389 = vmatpush1.bf16.msra.mxu1 %v388_v56  ;;  %v396_v5 = vpack.c.bf16 %v197_v4, %v195_v3  ;;  %v202_v7 = vld [vmem:[#allocation5 + $0x178] sm:$0xff]  ;;  %v199_v9 = vld [vmem:[#allocation5 + $0x160] sm:$0xff]  ;;  %v201_v10 = vld [vmem:[#allocation5 + $0x170] sm:$0xff] }
  0x38   :  { %371 = vmatprep.subr.bf16.mxu0 %v370_v27  ;;  %391 = vmatprep.subr.bf16.mxu1 %v390_v59  ;;  %v398_v8 = vpack.c.bf16 %v202_v7, %v200_v6  ;;  %v400_v11 = vpack.c.bf16 %v201_v10, %v199_v9  ;;  %v204_v12 = vld [vmem:[#allocation5 + $0x188] sm:$0xff]  ;;  %v206_v13 = vld [vmem:[#allocation5 + $0x198] sm:$0xff]  ;;  %v203_v15 = vld [vmem:[#allocation5 + $0x180] sm:$0xff] }
  0x39   :  { %v402_v14 = vpack.c.bf16 %v206_v13, %v204_v12  ;;  %v205_v16 = vld [vmem:[#allocation5 + $0x190] sm:$0xff]  ;;  %v208_v18 = vld [vmem:[#allocation5 + $0x1a8] sm:$0xff]  ;;  %v210_v19 = vld [vmem:[#allocation5 + $0x1b8] sm:$0xff] }
  0x3a   :  { %v404_v17 = vpack.c.bf16 %v205_v16, %v203_v15  ;;  %v406_v20 = vpack.c.bf16 %v210_v19, %v208_v18  ;;  %v207_v21 = vld [vmem:[#allocation5 + $0x1a0] sm:$0xff]  ;;  %v209_v22 = vld [vmem:[#allocation5 + $0x1b0] sm:$0xff]  ;;  %v212_v24 = vld [vmem:[#allocation5 + $0x1c8] sm:$0xff] }
  0x3b   :  { %373 = vmatpush1.bf16.msra.mxu0 %v372_v32  ;;  %393 = vmatpush1.bf16.msra.mxu1 %v392_v62  ;;  %v408_v23 = vpack.c.bf16 %v209_v22, %v207_v21  ;;  %v214_v25 = vld [vmem:[#allocation5 + $0x1d8] sm:$0xff]  ;;  %v211_v26 = vld [vmem:[#allocation5 + $0x1c0] sm:$0xff]  ;;  %v213_v28 = vld [vmem:[#allocation5 + $0x1d0] sm:$0xff] }
  0x3c   :  { %375 = vmatprep.subr.bf16.mxu0 %v374_v33  ;;  %395 = vmatprep.subr.bf16.mxu1 %v394_v2  ;;  %v410_v27 = vpack.c.bf16 %v214_v25, %v212_v24  ;;  %v216_v29 = vld [vmem:[#allocation5 + $0x1e8] sm:$0xff]  ;;  %v218_v30 = vld [vmem:[#allocation5 + $0x1f8] sm:$0xff]  ;;  %v412_v31 = vpack.c.bf16 %v213_v28, %v211_v26  ;;  %v215_v33 = vld [vmem:[#allocation5 + $0x1e0] sm:$0xff] }
  0x3d   :  { %v414_v32 = vpack.c.bf16 %v218_v30, %v216_v29  ;;  %v217_v34 = vld [vmem:[#allocation5 + $0x1f0] sm:$0xff] }
  0x3e   :  { %v416_v35 = vpack.c.bf16 %v217_v34, %v215_v33  ;;  %v351_v6 = vld [vmem:[%s604_s2 + $0x2] sm:$0x3] }
  0x3f   :  { %377 = vmatpush1.bf16.msra.mxu0 %v376_v38  ;;  %397 = vmatpush1.bf16.msra.mxu1 %v396_v5  ;;  %v85_v38 = vsub.s32 1, %v80_v37  ;;  %v225_v15 = vrot.slane %v351_v6, %v81_v51 }
  0x40   :  { %379 = vmatprep.subr.bf16.mxu0 %v378_v39  ;;  %399 = vmatprep.subr.bf16.mxu1 %v398_v8  ;;  %v77_v39 = vld [vmem:[%s604_s2] sm:$0x3]  ;;  %s521_s2 = smov [#allocation7]  }
  0x41   :  { %v86_v40 = vrot.slane %v77_v39, %v85_v38  ;;  %v82_v53 = vrot.slane %v77_v39, %v81_v51  ;;  %v229_v7 = vrot.slane %v351_v6, %v85_v38  ;;  %s336_s15 = sshll.u32 %s521_s2, 4  ;;  %s337_s15 = int_to_ptr.vmem [resolvable:$true] %s336_s15 }
  0x42   :  { %s486_s16 = scalar_lea.vmem %s337_s15, 256  ;;  %p491_p3 = scmp.lt.s32.totalorder %s337_s15, %s337_s15 }
  0x43   :  { %381 = vmatpush1.bf16.msra.mxu0 %v380_v44  ;;  %401 = vmatpush1.bf16.msra.mxu1 %v400_v11  ;;  %p487_p2 = scmp.ne.s32.totalorder %s337_s15, %s486_s16  ;;  %p492_p4 = scmp.lt.s32.totalorder %s486_s16, %s486_s16 }
  0x44   :  { %383 = vmatprep.subr.bf16.mxu0 %v382_v45  ;;  %403 = vmatprep.subr.bf16.mxu1 %v402_v14 }
  0x45   :  { %p493_p5 = por %p492_p4, %p491_p3 }
  0x47   :  { %385 = vmatpush1.bf16.msra.mxu0 %v384_v48  ;;  %405 = vmatpush1.bf16.msra.mxu1 %v404_v17  ;;  %p494_p6 = pnand %p493_p5, %p487_p2 }
  0x48   :  { %407 = vmatprep.subr.bf16.mxu1 %v406_v20 }
  0x4a   :  { %154 = vmatmul.mubr.f32.vlgmr.msra.gmra.mrb[0].mxu0 %v571_v49 }
  0x4b   :  { %159 = vmatprep.mubr.f32.mxu0 %v520_v0  ;;  %409 = vmatpush1.bf16.msra.mxu1 %v408_v23 }
  0x4c   :  { %411 = vmatprep.subr.bf16.mxu1 %v410_v27 }
  0x4e   :  { %160 = vmatmul.mubr.f32.gmra.mrb[2].mxu0 %v575_v50 }
  0x4f   :  { %413 = vmatpush1.bf16.msra.mxu1 %v412_v31 }
  0x50   :  { %415 = vmatprep.subr.bf16.mxu1 %v414_v32 }
  0x53   :  { %417 = vmatpush1.bf16.msra.mxu1 %v416_v35 }
 0x11d   :  { %v155_v41 = vpop.f32.mrb[0].mxu0 }
 0x11e   :  { %v157_v42 = vpop.f32.mrb[1].mxu0  ;;  %v156_v56 = vadd.f32 %v155_v41, %v82_v53 }
 0x11f   :  { %v158_v43 = vadd.f32 %v157_v42, %v86_v40 }
 0x120   :  { %v166_v58 = vmax.f32 %v156_v56, 0.0 }
 0x121   :  { %v349_v44 = vmul.f32 -1.442695, %v158_v43  ;;  %v161_v45 = vpop.f32.mrb[2].mxu0 }
 0x122   :  { %v163_v46 = vpop.f32.mrb[3].mxu0  ;;  %v162_v59 = vadd.f32 %v161_v45, %v82_v53  ;;  %v180_v60 = vsub.f32 %v571_v49, %v166_v58 }
 0x123   :  { %426 = vpow2.f32 %v349_v44  ;;  %v164_v47 = vadd.f32 %v163_v46, %v86_v40 }
 0x124   :  { %v167_v61 = vmax.f32 %v162_v59, 0.0 }
 0x125   :  { %v350_v48 = vmul.f32 -1.442695, %v164_v47 }
 0x126   :  { %v181_v1 = vsub.f32 %v575_v50, %v167_v61 }
 0x127   :  { %428 = vpow2.f32 %v350_v48 }
 0x12d   :  { %v427_v52 = vpop.eup %426 }
 0x12e   :  { %v174_v54 = vadd.f32 1.0, %v427_v52 }
 0x130   :  { %430 = vrcp.f32 %v174_v54 }
 0x131   :  { %v429_v55 = vpop.eup %428 }
 0x132   :  { %v175_v57 = vadd.f32 1.0, %v429_v55 }
 0x134   :  { %432 = vrcp.f32 %v175_v57 }
 0x13a   :  { %v431_v62 = vpop.eup %430 }
 0x13b   :  { %v182_v63 = vmul.f32 %v431_v62, %v180_v60 }
 0x13d   :  { %v184_v2 = vadd.f32 %v182_v63, %v166_v58 }
 0x13e   :  { %v433_v3 = vpop.eup %432 }
 0x13f   :  { %297 = vmatmul.mubr.f32.vlgmr.msra.gmra.mrb[0].mxu1 %v184_v2  ;;  %v183_v4 = vmul.f32 %v433_v3, %v181_v1 }
 0x140   :  { %302 = vmatprep.mubr.f32.mxu1 %v520_v0 }
 0x141   :  { %v185_v5 = vadd.f32 %v183_v4, %v167_v61 }
 0x143   :  { %303 = vmatmul.mubr.f32.gmra.mrb[2].mxu1 %v185_v5 }
 0x212   :  { %v298_v8 = vpop.f32.mrb[0].mxu1 }
 0x213   :  { %v300_v49 = vpop.f32.mrb[1].mxu1  ;;  %v299_v17 = vadd.f32 %v298_v8, %v225_v15 }
 0x214   :  { %v301_v9 = vadd.f32 %v300_v49, %v229_v7 }
 0x215   :  { %v309_v19 = vmax.f32 %v299_v17, 0.0 }
 0x216   :  { %v352_v10 = vmul.f32 -1.442695, %v301_v9  ;;  %v304_v11 = vpop.f32.mrb[2].mxu1 }
 0x217   :  { %v306_v12 = vpop.f32.mrb[3].mxu1  ;;  %v305_v20 = vadd.f32 %v304_v11, %v225_v15  ;;  %v323_v21 = vsub.f32 %v184_v2, %v309_v19 }
 0x218   :  { %434 = vpow2.f32 %v352_v10  ;;  %v307_v50 = vadd.f32 %v306_v12, %v229_v7 }
 0x219   :  { %v310_v22 = vmax.f32 %v305_v20, 0.0 }
 0x21a   :  { %v353_v13 = vmul.f32 -1.442695, %v307_v50 }
 0x21b   :  { %v324_v25 = vsub.f32 %v185_v5, %v310_v22 }
 0x21c   :  { %436 = vpow2.f32 %v353_v13 }
 0x222   :  { %v435_v14 = vpop.eup %434 }
 0x223   :  { %v317_v0 = vadd.f32 1.0, %v435_v14 }
 0x225   :  { %438 = vrcp.f32 %v317_v0 }
 0x226   :  { %v437_v16 = vpop.eup %436 }
 0x227   :  { %v318_v18 = vadd.f32 1.0, %v437_v16 }
 0x229   :  { %440 = vrcp.f32 %v318_v18 }
 0x22f   :  { %v439_v23 = vpop.eup %438 }
 0x230   :  { %v325_v24 = vmul.f32 %v439_v23, %v323_v21 }
 0x232   :  { %v327_v26 = vadd.f32 %v325_v24, %v309_v19 }
 0x233   :  { %v441_v27 = vpop.eup %440 }
 0x234   :  { %v326_v28 = vmul.f32 %v441_v27, %v324_v25  ;;  %329 = vst [vmem:[#allocation7] sm:$0xff] %v327_v26 }
 0x236   :  { %v328_v29 = vadd.f32 %v326_v28, %v310_v22 }
 0x238   :  { %330 = vst [vmem:[#allocation7 + $0x8] sm:$0xff] %v328_v29 }
 0x239   :  { %497 = shalt.err (!%p494_p6)
}
 0x23a   :  { %s498_s19 = scalar_lea.hbm %s605_s3, 256 }
 0x23b   :  { %p499_p7 = scmp.ne.s32.totalorder %s605_s3, %s498_s19  ;;  %p502_p8 = scmp.lt.u32.totalorder %s498_s19, %s605_s3 }
 0x23d   :  { %p504_p9 = pnand %p502_p8, %p499_p7 }
 0x23f   :  { %507 = shalt.err (!%p504_p9)
}
 0x240   :  { %342 = dma.vmem_to_hbm [thread:$0]  %s337_s15, 256, %s605_s3, [#allocation4], %s515_s22, %s515_s22, %s516_s23  }
 0x241   :  { %512 = dma.done.wait [#allocation4], 256  }
 0x242   :  { %513 = vsyncadd [#allocation4], 4294967040 }
 0x243   :  { %346 = vsyncpa [#allocation3], 1 }
 0x244   :  { %347 = vsyncpa [#allocation6], 1 }
 0x245   :  { %348 = vsyncpa [#allocation4], 1 }

// kernel: tpu_custom_call.1
= control target key start
LH: loop header
LB: loop body
LE: loop exit
PB: predicated region body
PF: predicated region fallthrough
CT: control target
= control target key end

     0   :  { %8 = vsyncpa [#allocation3], 0  ;;  %s602_s0 = inlined_call_operand.hbm [shape: f32[13,128], index: 0, kind: input, shape index: {}]   ;;  %s603_s1 = inlined_call_operand.hbm [shape: f32[2,128,256], index: 1, kind: input, shape index: {}]   ;;  %s604_s2 = inlined_call_operand.vmem [shape: f32[2,1,256], index: 2, kind: input, shape index: {}]   ;;  %s605_s3 = inlined_call_operand.hbm [shape: f32[13,128], index: 3, kind: output, shape index: {}]  }
   0x1   :  { %9 = vsyncpa [#allocation6], 0 }
   0x2   :  { %10 = vsyncpa [#allocation4], 0  ;;  %s514_s12 = smov [#allocation2]   ;;  %s442_s16 = scalar_lea.hbm %s602_s0, 256 }
   0x3   :  { %s16_s13 = sshll.u32 %s514_s12, 4  ;;  %p443_p0 = scmp.ne.s32.totalorder %s602_s0, %s442_s16  ;;  %s17_s13 = int_to_ptr.vmem [resolvable:$true] %s16_s13 }
   0x4   :  { %p446_p1 = scmp.lt.u32.totalorder %s442_s16, %s602_s0 }
   0x6   :  { %p448_p2 = pnand %p446_p1, %p443_p0 }
   0x8   :  { %451 = shalt.err (!%p448_p2)
}
   0x9   :  { %s452_s21 = scalar_lea.vmem %s17_s13, 256  ;;  %p457_p4 = scmp.lt.s32.totalorder %s17_s13, %s17_s13 }
   0xa   :  { %p453_p3 = scmp.ne.s32.totalorder %s17_s13, %s452_s21  ;;  %p458_p5 = scmp.lt.s32.totalorder %s452_s21, %s452_s21 }
   0xc   :  { %p459_p6 = por %p458_p5, %p457_p4 }
   0xe   :  { %p460_p7 = pnand %p459_p6, %p453_p3 }
  0x10   :  { %463 = shalt.err (!%p460_p7)
}
  0x11   :  { %s515_s22 = smov 128   ;;  %s516_s23 = smov 8  }
  0x12   :  { %22 = dma.hbm_to_vmem [thread:$0]  %s602_s0, 256, %s17_s13, [#allocation3], %s515_s22, %s515_s22, %s516_s23  }
  0x13   :  { %s517_s26 = smov [#allocation5]   ;;  %s464_s30 = scalar_lea.hbm %s603_s1, 8192 }
  0x14   :  { %s28_s27 = sshll.u32 %s517_s26, 4  ;;  %p465_p8 = scmp.ne.s32.totalorder %s603_s1, %s464_s30  ;;  %s29_s27 = int_to_ptr.vmem [resolvable:$true] %s28_s27 }
  0x15   :  { %p468_p9 = scmp.lt.u32.totalorder %s464_s30, %s603_s1 }
  0x17   :  { %p470_p10 = pnand %p468_p9, %p465_p8 }
  0x19   :  { %473 = shalt.err (!%p470_p10)
}
  0x1a   :  { %s474_s8 = scalar_lea.vmem %s29_s27, 8192  ;;  %p479_p12 = scmp.lt.s32.totalorder %s29_s27, %s29_s27 }
  0x1b   :  { %p475_p11 = scmp.ne.s32.totalorder %s29_s27, %s474_s8  ;;  %p480_p13 = scmp.lt.s32.totalorder %s474_s8, %s474_s8 }
  0x1d   :  { %p481_p0 = por %p480_p13, %p479_p12 }
  0x1f   :  { %p482_p1 = pnand %p481_p0, %p475_p11 }
  0x21   :  { %485 = shalt.err (!%p482_p1)
}
  0x22   :  { %s518_s0 = smov 256   ;;  %s519_s9 = smov 16  }
  0x23   :  { %34 = dma.hbm_to_vmem [thread:$0]  %s603_s1, 8192, %s29_s27, [#allocation6], %s518_s0, %s518_s0, %s519_s9  }
  0x24   :  { %508 = dma.done.wait [#allocation3], 256  }
  0x25   :  { %509 = vsyncadd [#allocation3], 4294967040 }
  0x26   :  { %510 = dma.done.wait [#allocation6], 8192  }
  0x27   :  { %511 = vsyncadd [#allocation6], 4294959104  ;;  %v520_v0 = vmov 0.0   ;;  %v46_v1 = vld [vmem:[#allocation5 + $0x8] sm:$0xff]  ;;  %v48_v2 = vld [vmem:[#allocation5 + $0x18] sm:$0xff] }
  0x28   :  { %153 = vmatprep.mubr.f32.mxu0 %v520_v0  ;;  %296 = vmatprep.mubr.f32.mxu1 %v520_v0  ;;  %v45_v3 = vld [vmem:[#allocation5] sm:$0xff]  ;;  %v354_v4 = vpack.c.bf16 %v48_v2, %v46_v1  ;;  %v47_v5 = vld [vmem:[#allocation5 + $0x10] sm:$0xff]  ;;  %v50_v6 = vld [vmem:[#allocation5 + $0x28] sm:$0xff] }
  0x29   :  { %v52_v7 = vld [vmem:[#allocation5 + $0x38] sm:$0xff]  ;;  %v356_v8 = vpack.c.bf16 %v47_v5, %v45_v3  ;;  %v49_v10 = vld [vmem:[#allocation5 + $0x20] sm:$0xff]  ;;  %v51_v11 = vld [vmem:[#allocation5 + $0x30] sm:$0xff] }
  0x2a   :  { %v358_v9 = vpack.c.bf16 %v52_v7, %v50_v6  ;;  %v54_v12 = vld [vmem:[#allocation5 + $0x48] sm:$0xff]  ;;  %355 = vmatprep.subr.bf16.mxu0 %v354_v4  ;;  %v56_v13 = vld [vmem:[#allocation5 + $0x58] sm:$0xff]  ;;  %v360_v14 = vpack.c.bf16 %v51_v11, %v49_v10  ;;  %v53_v16 = vld [vmem:[#allocation5 + $0x40] sm:$0xff] }
  0x2b   :  { %357 = vmatpush1.bf16.msra.mxu0 %v356_v8  ;;  %v362_v15 = vpack.c.bf16 %v56_v13, %v54_v12  ;;  %v55_v17 = vld [vmem:[#allocation5 + $0x50] sm:$0xff]  ;;  %v58_v18 = vld [vmem:[#allocation5 + $0x68] sm:$0xff]  ;;  %v60_v19 = vld [vmem:[#allocation5 + $0x78] sm:$0xff] }
  0x2c   :  { %359 = vmatprep.subr.bf16.mxu0 %v358_v9  ;;  %v364_v20 = vpack.c.bf16 %v55_v17, %v53_v16  ;;  %v366_v21 = vpack.c.bf16 %v60_v19, %v58_v18  ;;  %v57_v22 = vld [vmem:[#allocation5 + $0x60] sm:$0xff]  ;;  %v59_v23 = vld [vmem:[#allocation5 + $0x70] sm:$0xff]  ;;  %v62_v24 = vld [vmem:[#allocation5 + $0x88] sm:$0xff] }
  0x2d   :  { %v64_v25 = vld [vmem:[#allocation5 + $0x98] sm:$0xff]  ;;  %v368_v26 = vpack.c.bf16 %v59_v23, %v57_v22  ;;  %v61_v28 = vld [vmem:[#allocation5 + $0x80] sm:$0xff]  ;;  %v63_v29 = vld [vmem:[#allocation5 + $0x90] sm:$0xff] }
  0x2e   :  { %v370_v27 = vpack.c.bf16 %v64_v25, %v62_v24  ;;  %v66_v30 = vld [vmem:[#allocation5 + $0xa8] sm:$0xff]  ;;  %v68_v31 = vld [vmem:[#allocation5 + $0xb8] sm:$0xff]  ;;  %v372_v32 = vpack.c.bf16 %v63_v29, %v61_v28  ;;  %v65_v34 = vld [vmem:[#allocation5 + $0xa0] sm:$0xff] }
  0x2f   :  { %361 = vmatpush1.bf16.msra.mxu0 %v360_v14  ;;  %v374_v33 = vpack.c.bf16 %v68_v31, %v66_v30  ;;  %v67_v35 = vld [vmem:[#allocation5 + $0xb0] sm:$0xff]  ;;  %v70_v36 = vld [vmem:[#allocation5 + $0xc8] sm:$0xff]  ;;  %v72_v37 = vld [vmem:[#allocation5 + $0xd8] sm:$0xff] }
  0x30   :  { %363 = vmatprep.subr.bf16.mxu0 %v362_v15  ;;  %v376_v38 = vpack.c.bf16 %v67_v35, %v65_v34  ;;  %v378_v39 = vpack.c.bf16 %v72_v37, %v70_v36  ;;  %v69_v40 = vld [vmem:[#allocation5 + $0xc0] sm:$0xff]  ;;  %v71_v41 = vld [vmem:[#allocation5 + $0xd0] sm:$0xff]  ;;  %v74_v42 = vld [vmem:[#allocation5 + $0xe8] sm:$0xff]  ;;  %v79_v36 = vlaneseq }
  0x31   :  { %v76_v43 = vld [vmem:[#allocation5 + $0xf8] sm:$0xff]  ;;  %v380_v44 = vpack.c.bf16 %v71_v41, %v69_v40  ;;  %v73_v46 = vld [vmem:[#allocation5 + $0xe0] sm:$0xff]  ;;  %v75_v47 = vld [vmem:[#allocation5 + $0xf0] sm:$0xff] }
  0x32   :  { %v382_v45 = vpack.c.bf16 %v76_v43, %v74_v42  ;;  %v384_v48 = vpack.c.bf16 %v75_v47, %v73_v46  ;;  %v571_v49 = vld [vmem:[#allocation2] sm:$0xff]  ;;  %v575_v50 = vld [vmem:[#allocation2 + $0x8] sm:$0xff]  ;;  %v188_v51 = vld [vmem:[#allocation5 + $0x108] sm:$0xff]  ;;  %v80_v37 = vshrl.u32 %v79_v36, 7 }
  0x33   :  { %365 = vmatpush1.bf16.msra.mxu0 %v364_v20  ;;  %v190_v52 = vld [vmem:[#allocation5 + $0x118] sm:$0xff]  ;;  %v187_v54 = vld [vmem:[#allocation5 + $0x100] sm:$0xff]  ;;  %v189_v55 = vld [vmem:[#allocation5 + $0x110] sm:$0xff] }
  0x34   :  { %367 = vmatprep.subr.bf16.mxu0 %v366_v21  ;;  %v386_v53 = vpack.c.bf16 %v190_v52, %v188_v51  ;;  %v388_v56 = vpack.c.bf16 %v189_v55, %v187_v54  ;;  %v192_v57 = vld [vmem:[#allocation5 + $0x128] sm:$0xff]  ;;  %v194_v58 = vld [vmem:[#allocation5 + $0x138] sm:$0xff]  ;;  %v191_v60 = vld [vmem:[#allocation5 + $0x120] sm:$0xff]  ;;  %v81_v51 = vsub.s32 0, %v80_v37 }
  0x35   :  { %v390_v59 = vpack.c.bf16 %v194_v58, %v192_v57  ;;  %v193_v61 = vld [vmem:[#allocation5 + $0x130] sm:$0xff]  ;;  %v196_v63 = vld [vmem:[#allocation5 + $0x148] sm:$0xff]  ;;  %v198_v1 = vld [vmem:[#allocation5 + $0x158] sm:$0xff] }
  0x36   :  { %387 = vmatprep.subr.bf16.mxu1 %v386_v53  ;;  %v392_v62 = vpack.c.bf16 %v193_v61, %v191_v60  ;;  %v394_v2 = vpack.c.bf16 %v198_v1, %v196_v63  ;;  %v195_v3 = vld [vmem:[#allocation5 + $0x140] sm:$0xff]  ;;  %v197_v4 = vld [vmem:[#allocation5 + $0x150] sm:$0xff]  ;;  %v200_v6 = vld [vmem:[#allocation5 + $0x168] sm:$0xff] }
  0x37   :  { %369 = vmatpush1.bf16.msra.mxu0 %v368_v26  ;;  %389 = vmatpush1.bf16.msra.mxu1 %v388_v56  ;;  %v396_v5 = vpack.c.bf16 %v197_v4, %v195_v3  ;;  %v202_v7 = vld [vmem:[#allocation5 + $0x178] sm:$0xff]  ;;  %v199_v9 = vld [vmem:[#allocation5 + $0x160] sm:$0xff]  ;;  %v201_v10 = vld [vmem:[#allocation5 + $0x170] sm:$0xff] }
  0x38   :  { %371 = vmatprep.subr.bf16.mxu0 %v370_v27  ;;  %391 = vmatprep.subr.bf16.mxu1 %v390_v59  ;;  %v398_v8 = vpack.c.bf16 %v202_v7, %v200_v6  ;;  %v400_v11 = vpack.c.bf16 %v201_v10, %v199_v9  ;;  %v204_v12 = vld [vmem:[#allocation5 + $0x188] sm:$0xff]  ;;  %v206_v13 = vld [vmem:[#allocation5 + $0x198] sm:$0xff]  ;;  %v203_v15 = vld [vmem:[#allocation5 + $0x180] sm:$0xff] }
  0x39   :  { %v402_v14 = vpack.c.bf16 %v206_v13, %v204_v12  ;;  %v205_v16 = vld [vmem:[#allocation5 + $0x190] sm:$0xff]  ;;  %v208_v18 = vld [vmem:[#allocation5 + $0x1a8] sm:$0xff]  ;;  %v210_v19 = vld [vmem:[#allocation5 + $0x1b8] sm:$0xff] }
  0x3a   :  { %v404_v17 = vpack.c.bf16 %v205_v16, %v203_v15  ;;  %v406_v20 = vpack.c.bf16 %v210_v19, %v208_v18  ;;  %v207_v21 = vld [vmem:[#allocation5 + $0x1a0] sm:$0xff]  ;;  %v209_v22 = vld [vmem:[#allocation5 + $0x1b0] sm:$0xff]  ;;  %v212_v24 = vld [vmem:[#allocation5 + $0x1c8] sm:$0xff] }
  0x3b   :  { %373 = vmatpush1.bf16.msra.mxu0 %v372_v32  ;;  %393 = vmatpush1.bf16.msra.mxu1 %v392_v62  ;;  %v408_v23 = vpack.c.bf16 %v209_v22, %v207_v21  ;;  %v214_v25 = vld [vmem:[#allocation5 + $0x1d8] sm:$0xff]  ;;  %v211_v26 = vld [vmem:[#allocation5 + $0x1c0] sm:$0xff]  ;;  %v213_v28 = vld [vmem:[#allocation5 + $0x1d0] sm:$0xff] }
  0x3c   :  { %375 = vmatprep.subr.bf16.mxu0 %v374_v33  ;;  %395 = vmatprep.subr.bf16.mxu1 %v394_v2  ;;  %v410_v27 = vpack.c.bf16 %v214_v25, %v212_v24  ;;  %v216_v29 = vld [vmem:[#allocation5 + $0x1e8] sm:$0xff]  ;;  %v218_v30 = vld [vmem:[#allocation5 + $0x1f8] sm:$0xff]  ;;  %v412_v31 = vpack.c.bf16 %v213_v28, %v211_v26  ;;  %v215_v33 = vld [vmem:[#allocation5 + $0x1e0] sm:$0xff] }
  0x3d   :  { %v414_v32 = vpack.c.bf16 %v218_v30, %v216_v29  ;;  %v217_v34 = vld [vmem:[#allocation5 + $0x1f0] sm:$0xff] }
  0x3e   :  { %v416_v35 = vpack.c.bf16 %v217_v34, %v215_v33  ;;  %v351_v6 = vld [vmem:[%s604_s2 + $0x2] sm:$0x3] }
  0x3f   :  { %377 = vmatpush1.bf16.msra.mxu0 %v376_v38  ;;  %397 = vmatpush1.bf16.msra.mxu1 %v396_v5  ;;  %v85_v38 = vsub.s32 1, %v80_v37  ;;  %v225_v15 = vrot.slane %v351_v6, %v81_v51 }
  0x40   :  { %379 = vmatprep.subr.bf16.mxu0 %v378_v39  ;;  %399 = vmatprep.subr.bf16.mxu1 %v398_v8  ;;  %v77_v39 = vld [vmem:[%s604_s2] sm:$0x3]  ;;  %s521_s2 = smov [#allocation7]  }
  0x41   :  { %v86_v40 = vrot.slane %v77_v39, %v85_v38  ;;  %v82_v53 = vrot.slane %v77_v39, %v81_v51  ;;  %v229_v7 = vrot.slane %v351_v6, %v85_v38  ;;  %s336_s15 = sshll.u32 %s521_s2, 4  ;;  %s337_s15 = int_to_ptr.vmem [resolvable:$true] %s336_s15 }
  0x42   :  { %s486_s16 = scalar_lea.vmem %s337_s15, 256  ;;  %p491_p3 = scmp.lt.s32.totalorder %s337_s15, %s337_s15 }
  0x43   :  { %381 = vmatpush1.bf16.msra.mxu0 %v380_v44  ;;  %401 = vmatpush1.bf16.msra.mxu1 %v400_v11  ;;  %p487_p2 = scmp.ne.s32.totalorder %s337_s15, %s486_s16  ;;  %p492_p4 = scmp.lt.s32.totalorder %s486_s16, %s486_s16 }
  0x44   :  { %383 = vmatprep.subr.bf16.mxu0 %v382_v45  ;;  %403 = vmatprep.subr.bf16.mxu1 %v402_v14 }
  0x45   :  { %p493_p5 = por %p492_p4, %p491_p3 }
  0x47   :  { %385 = vmatpush1.bf16.msra.mxu0 %v384_v48  ;;  %405 = vmatpush1.bf16.msra.mxu1 %v404_v17  ;;  %p494_p6 = pnand %p493_p5, %p487_p2 }
  0x48   :  { %407 = vmatprep.subr.bf16.mxu1 %v406_v20 }
  0x4a   :  { %154 = vmatmul.mubr.f32.vlgmr.msra.gmra.mrb[0].mxu0 %v571_v49 }
  0x4b   :  { %159 = vmatprep.mubr.f32.mxu0 %v520_v0  ;;  %409 = vmatpush1.bf16.msra.mxu1 %v408_v23 }
  0x4c   :  { %411 = vmatprep.subr.bf16.mxu1 %v410_v27 }
  0x4e   :  { %160 = vmatmul.mubr.f32.gmra.mrb[2].mxu0 %v575_v50 }
  0x4f   :  { %413 = vmatpush1.bf16.msra.mxu1 %v412_v31 }
  0x50   :  { %415 = vmatprep.subr.bf16.mxu1 %v414_v32 }
  0x53   :  { %417 = vmatpush1.bf16.msra.mxu1 %v416_v35 }
 0x11d   :  { %v155_v41 = vpop.f32.mrb[0].mxu0 }
 0x11e   :  { %v157_v42 = vpop.f32.mrb[1].mxu0  ;;  %v156_v56 = vadd.f32 %v155_v41, %v82_v53 }
 0x11f   :  { %v158_v43 = vadd.f32 %v157_v42, %v86_v40 }
 0x120   :  { %v166_v58 = vmax.f32 %v156_v56, 0.0 }
 0x121   :  { %v349_v44 = vmul.f32 -1.442695, %v158_v43  ;;  %v161_v45 = vpop.f32.mrb[2].mxu0 }
 0x122   :  { %v163_v46 = vpop.f32.mrb[3].mxu0  ;;  %v162_v59 = vadd.f32 %v161_v45, %v82_v53  ;;  %v180_v60 = vsub.f32 %v571_v49, %v166_v58 }
 0x123   :  { %426 = vpow2.f32 %v349_v44  ;;  %v164_v47 = vadd.f32 %v163_v46, %v86_v40 }
 0x124   :  { %v167_v61 = vmax.f32 %v162_v59, 0.0 }
 0x125   :  { %v350_v48 = vmul.f32 -1.442695, %v164_v47 }
 0x126   :  { %v181_v1 = vsub.f32 %v575_v50, %v167_v61 }
 0x127   :  { %428 = vpow2.f32 %v350_v48 }
 0x12d   :  { %v427_v52 = vpop.eup %426 }
 0x12e   :  { %v174_v54 = vadd.f32 1.0, %v427_v52 }
 0x130   :  { %430 = vrcp.f32 %v174_v54 }
 0x131   :  { %v429_v55 = vpop.eup %428 }
 0x132   :  { %v175_v57 = vadd.f32 1.0, %v429_v55 }
 0x134   :  { %432 = vrcp.f32 %v175_v57 }
 0x13a   :  { %v431_v62 = vpop.eup %430 }
 0x13b   :  { %v182_v63 = vmul.f32 %v431_v62, %v180_v60 }
 0x13d   :  { %v184_v2 = vadd.f32 %v182_v63, %v166_v58 }
 0x13e   :  { %v433_v3 = vpop.eup %432 }
 0x13f   :  { %297 = vmatmul.mubr.f32.vlgmr.msra.gmra.mrb[0].mxu1 %v184_v2  ;;  %v183_v4 = vmul.f32 %v433_v3, %v181_v1 }
 0x140   :  { %302 = vmatprep.mubr.f32.mxu1 %v520_v0 }
 0x141   :  { %v185_v5 = vadd.f32 %v183_v4, %v167_v61 }
 0x143   :  { %303 = vmatmul.mubr.f32.gmra.mrb[2].mxu1 %v185_v5 }
 0x212   :  { %v298_v8 = vpop.f32.mrb[0].mxu1 }
 0x213   :  { %v300_v49 = vpop.f32.mrb[1].mxu1  ;;  %v299_v17 = vadd.f32 %v298_v8, %v225_v15 }
 0x214   :  { %v301_v9 = vadd.f32 %v300_v49, %v229_v7 }
 0x215   :  { %v309_v19 = vmax.f32 %v299_v17, 0.0 }
 0x216   :  { %v352_v10 = vmul.f32 -1.442695, %v301_v9  ;;  %v304_v11 = vpop.f32.mrb[2].mxu1 }
 0x217   :  { %v306_v12 = vpop.f32.mrb[3].mxu1  ;;  %v305_v20 = vadd.f32 %v304_v11, %v225_v15  ;;  %v323_v21 = vsub.f32 %v184_v2, %v309_v19 }
 0x218   :  { %434 = vpow2.f32 %v352_v10  ;;  %v307_v50 = vadd.f32 %v306_v12, %v229_v7 }
 0x219   :  { %v310_v22 = vmax.f32 %v305_v20, 0.0 }
 0x21a   :  { %v353_v13 = vmul.f32 -1.442695, %v307_v50 }
 0x21b   :  { %v324_v25 = vsub.f32 %v185_v5, %v310_v22 }
 0x21c   :  { %436 = vpow2.f32 %v353_v13 }
 0x222   :  { %v435_v14 = vpop.eup %434 }
 0x223   :  { %v317_v0 = vadd.f32 1.0, %v435_v14 }
 0x225   :  { %438 = vrcp.f32 %v317_v0 }
 0x226   :  { %v437_v16 = vpop.eup %436 }
 0x227   :  { %v318_v18 = vadd.f32 1.0, %v437_v16 }
 0x229   :  { %440 = vrcp.f32 %v318_v18 }
 0x22f   :  { %v439_v23 = vpop.eup %438 }
 0x230   :  { %v325_v24 = vmul.f32 %v439_v23, %v323_v21 }
 0x232   :  { %v327_v26 = vadd.f32 %v325_v24, %v309_v19 }
 0x233   :  { %v441_v27 = vpop.eup %440 }
 0x234   :  { %v326_v28 = vmul.f32 %v441_v27, %v324_v25  ;;  %329 = vst [vmem:[#allocation7] sm:$0xff] %v327_v26 }
 0x236   :  { %v328_v29 = vadd.f32 %v326_v28, %v310_v22 }
 0x238   :  { %330 = vst [vmem:[#allocation7 + $0x8] sm:$0xff] %v328_v29 }
 0x239   :  { %497 = shalt.err (!%p494_p6)
}
 0x23a   :  { %s498_s19 = scalar_lea.hbm %s605_s3, 256 }
 0x23b   :  { %p499_p7 = scmp.ne.s32.totalorder %s605_s3, %s498_s19  ;;  %p502_p8 = scmp.lt.u32.totalorder %s498_s19, %s605_s3 }
 0x23d   :  { %p504_p9 = pnand %p502_p8, %p499_p7 }
 0x23f   :  { %507 = shalt.err (!%p504_p9)
}
 0x240   :  { %342 = dma.vmem_to_hbm [thread:$0]  %s337_s15, 256, %s605_s3, [#allocation4], %s515_s22, %s515_s22, %s516_s23  }
 0x241   :  { %512 = dma.done.wait [#allocation4], 256  }
 0x242   :  { %513 = vsyncadd [#allocation4], 4294967040 }
 0x243   :  { %346 = vsyncpa [#allocation3], 1 }
 0x244   :  { %347 = vsyncpa [#allocation6], 1 }
 0x245   :  { %348 = vsyncpa [#allocation4], 1 }

</bundles_post_ra>
